<compile_context>
chip_gen: v5e
topology: v5e:2x2
jax: 0.10.0
libtpu: 0.0.40
codegen_flags: <defaults>
</compile_context>

<pallas_src>
import math

import jax
import jax.numpy as jnp
from jax.experimental import pallas as pl
from jax.experimental.pallas import tpu as pltpu

_LANES = 128


def _global_max_kernel(x_ref, o_ref, acc_ref):
    # x_ref : (TR, TS) input tile (TS a multiple of 128)
    # o_ref : (TR, 1) output tile (resident across the spatial grid axis)
    # acc_ref: (TR, 128) f32 running element-wise max
    j = pl.program_id(1)

    @pl.when(j == 0)
    def _init():
        acc_ref[...] = jnp.full_like(acc_ref, -jnp.inf)

    x = x_ref[...]                      # (TR, TS)
    acc = acc_ref[...]                  # (TR, 128) f32
    n_chunks = x.shape[1] // _LANES
    # Element-wise max over lane-aligned chunks -> pure VPU work; the cross-lane
    # reduce is deferred to one XLU pass per output tile below.
    for c in range(n_chunks):
        chunk = x[:, c * _LANES:(c + 1) * _LANES].astype(jnp.float32)
        acc = jnp.maximum(acc, chunk)
    acc_ref[...] = acc

    @pl.when(j == pl.num_programs(1) - 1)
    def _finalize():
        o_ref[...] = jnp.max(acc_ref[...], axis=-1, keepdims=True).astype(o_ref.dtype)


def _round_up(a, b):
    return (a + b - 1) // b * b


def global_max_pool(x):
    """Global max pool over all dims >= 2.  x: (N, C, *spatial) -> (N, C)."""
    N, C = x.shape[0], x.shape[1]
    spatial = x.shape[2:]
    if len(spatial) == 0:
        raise ValueError("expected at least one spatial dimension")
    S = math.prod(spatial)
    R = N * C

    dtype = jnp.dtype(x.dtype)
    itemsize = dtype.itemsize
    if jnp.issubdtype(dtype, jnp.floating):
        pad_val = -jnp.inf
    else:
        pad_val = jnp.iinfo(dtype).min  # TODO(synk): integer path accumulates in f32 (inexact >2^24)

    x2d = x.reshape(R, S)

    # ---- tile-size derivation --------------------------------------------
    # Spatial tile: multiple of 128 lanes, capped so per-block DMAs stay modest.
    ts_max = 2048
    S_pad = _round_up(S, _LANES)
    TS = min(S_pad, ts_max)
    S_pad = _round_up(S_pad, TS)

    # Row tile: multiple of the sublane alignment for this dtype; sized so that
    # the double-buffered input tiles stay within a conservative ~8 MiB budget
    # (fits every generation's scoped VMEM default, incl. v5e's 16 MiB).
    row_align = 8 if itemsize >= 4 else (32 // max(itemsize, 1))
    vmem_budget = 8 * 1024 * 1024
    tr_cap = max(row_align,
                 (vmem_budget // (2 * TS * itemsize)) // row_align * row_align)
    TR = min(_round_up(R, row_align), tr_cap, 1024)
    R_pad = _round_up(R, TR)

    # ---- padding (dtype-min so padded lanes/rows never win the max) -------
    if (R_pad, S_pad) != (R, S):
        x2d = jnp.pad(x2d, ((0, R_pad - R), (0, S_pad - S)),
                      mode="constant", constant_values=pad_val)

    grid = (R_pad // TR, S_pad // TS)

    out2d = pl.pallas_call(
        _global_max_kernel,
        out_shape=jax.ShapeDtypeStruct((R_pad, 1), x.dtype),
        grid=grid,
        in_specs=[pl.BlockSpec((TR, TS), lambda i, j: (i, j))],
        out_specs=pl.BlockSpec((TR, 1), lambda i, j: (i, 0)),
        scratch_shapes=[pltpu.VMEM((TR, _LANES), jnp.float32)],
        compiler_params=pltpu.CompilerParams(
            dimension_semantics=("parallel", "arbitrary"),
            vmem_limit_bytes=32 * 1024 * 1024,
        ),
    )(x2d)

    return out2d[:R, 0].reshape(N, C)


if __name__ == "__main__":
    key = jax.random.PRNGKey(0)

    # dim=2 case: NCHW input, small aligned shapes.
    x = jax.random.normal(key, (2, 4, 16, 16), dtype=jnp.float32)
    out = jax.block_until_ready(global_max_pool(x))
    ref = jnp.max(x.reshape(2, 4, -1), axis=-1)
    assert out.shape == (2, 4)
    assert jnp.allclose(out, ref), "mismatch vs reference (2D case)"

    # dim=3 case with unaligned rows/spatial and negative-heavy values:
    # exercises the -inf padding of both the row and lane axes.
    k2 = jax.random.split(key)[0]
    x3 = jax.random.normal(k2, (2, 3, 4, 5, 5), dtype=jnp.float32) - 5.0
    out3 = jax.block_until_ready(global_max_pool(x3))
    ref3 = jnp.max(x3.reshape(2, 3, -1), axis=-1)
    assert out3.shape == (2, 3)
    assert jnp.allclose(out3, ref3), "mismatch vs reference (3D / padded case)"

    print("KERNEL_OK")
</pallas_src>

<mosaic_0001>
module attributes {stable_mosaic.version = 11 : i64} {
  func.func @_global_max_kernel(%arg0: i32, %arg1: i32, %arg2: memref<8x256xf32, #tpu.memory_space<vmem>>, %arg3: memref<8x1xf32, #tpu.memory_space<vmem>>, %arg4: memref<8x128xf32, #tpu.memory_space<vmem>>) attributes {dimension_semantics = [#tpu.dimension_semantics<parallel>, #tpu.dimension_semantics<arbitrary>], iteration_bounds = array<i64: 1, 1>, scalar_prefetch = 0 : i64, scratch_operands = 1 : i64, tpu.core_type = #tpu.core_type<tc>, window_params = [{transform_indices = @transform_0, window_bounds = array<i64: 8, 256>}, {transform_indices = @transform_1, window_bounds = array<i64: 8, 1>}]} {
    %c0_i32 = arith.constant 0 : i32
    %0 = arith.cmpi eq, %arg1, %c0_i32 : i32
    %1 = arith.extui %0 : i1 to i32
    %c0_i32_0 = arith.constant 0 : i32
    %2 = arith.cmpi ne, %1, %c0_i32_0 : i32
    scf.if %2 {
      %cst = arith.constant 0xFF800000 : f32
      %13 = vector.broadcast %cst : f32 to vector<8x128xf32>
      %c0_8 = arith.constant 0 : index
      %c0_9 = arith.constant 0 : index
      %14 = vector.load %arg4[%c0_8, %c0_9] : memref<8x128xf32, #tpu.memory_space<vmem>>, vector<8x128xf32>
      tpu.vector_store %arg4[%c0_8, %c0_9], %13 {strides = array<i32>} : memref<8x128xf32, #tpu.memory_space<vmem>>, vector<8x128xf32>,
    } else {
    }
    %c0 = arith.constant 0 : index
    %c0_1 = arith.constant 0 : index
    %3 = vector.load %arg2[%c0, %c0_1] : memref<8x256xf32, #tpu.memory_space<vmem>>, vector<8x256xf32>
    %c0_2 = arith.constant 0 : index
    %c0_3 = arith.constant 0 : index
    %4 = vector.load %arg4[%c0_2, %c0_3] : memref<8x128xf32, #tpu.memory_space<vmem>>, vector<8x128xf32>
    %5 = vector.extract_strided_slice %3 {offsets = [0, 0], sizes = [8, 128], strides = [1, 1]} : vector<8x256xf32> to vector<8x128xf32>
    %6 = arith.maximumf %4, %5 : vector<8x128xf32>
    %7 = vector.extract_strided_slice %3 {offsets = [0, 128], sizes = [8, 128], strides = [1, 1]} : vector<8x256xf32> to vector<8x128xf32>
    %8 = arith.maximumf %6, %7 : vector<8x128xf32>
    %c0_4 = arith.constant 0 : index
    %c0_5 = arith.constant 0 : index
    %9 = vector.load %arg4[%c0_4, %c0_5] : memref<8x128xf32, #tpu.memory_space<vmem>>, vector<8x128xf32>
    tpu.vector_store %arg4[%c0_4, %c0_5], %8 {strides = array<i32>} : memref<8x128xf32, #tpu.memory_space<vmem>>, vector<8x128xf32>,
    %c0_i32_6 = arith.constant 0 : i32
    %10 = arith.cmpi eq, %arg1, %c0_i32_6 : i32
    %11 = arith.extui %10 : i1 to i32
    %c0_i32_7 = arith.constant 0 : i32
    %12 = arith.cmpi ne, %11, %c0_i32_7 : i32
    scf.if %12 {
      %c0_8 = arith.constant 0 : index
      %c0_9 = arith.constant 0 : index
      %13 = vector.load %arg4[%c0_8, %c0_9] : memref<8x128xf32, #tpu.memory_space<vmem>>, vector<8x128xf32>
      %cst = arith.constant dense<0xFF800000> : vector<8xf32>
      %14 = vector.multi_reduction <maximumf>, %13, %cst [1] : vector<8x128xf32> to vector<8xf32>
      %15 = vector.shape_cast %14 : vector<8xf32> to vector<8x1xf32>
      %c0_10 = arith.constant 0 : index
      %c0_11 = arith.constant 0 : index
      %16 = vector.load %arg3[%c0_10, %c0_11] : memref<8x1xf32, #tpu.memory_space<vmem>>, vector<8x1xf32>
      tpu.vector_store %arg3[%c0_10, %c0_11], %15 {strides = array<i32>} : memref<8x1xf32, #tpu.memory_space<vmem>>, vector<8x1xf32>,
    } else {
    }
    return
  }
  func.func @transform_0(%arg0: i32, %arg1: i32) -> (i32, i32) {
    %c0_i32 = arith.constant 0 : i32
    return %arg0, %arg1 : i32, i32
  }
  func.func @transform_1(%arg0: i32, %arg1: i32) -> (i32, i32) {
    %c0_i32 = arith.constant 0 : i32
    %c0_i32_0 = arith.constant 0 : i32
    return %arg0, %c0_i32 : i32, i32
  }
}

</mosaic_0001>

<bundles_post_ra>
// kernel: tpu_custom_call.1
= control target key start
LH: loop header
LB: loop body
LE: loop exit
PB: predicated region body
PF: predicated region fallthrough
CT: control target
= control target key end

     0   :  { %6 = vsyncpa [#allocation4], 0  ;;  %s73_s9 = smov [#allocation3]   ;;  %s90_s0 = inlined_call_operand.hbm [shape: f32[8,256], index: 0, kind: input, shape index: {}]   ;;  %s91_s1 = inlined_call_operand.vmem [shape: f32[8,1], index: 1, kind: output, shape index: {}]  }
   0x1   :  { %s12_s8 = sshll.u32 %s90_s0, 4  ;;  %s14_s10 = sshll.u32 %s73_s9, 4  ;;  %s13_s8 = int_to_ptr.hbm [resolvable:$true] %s12_s8  ;;  %s15_s10 = int_to_ptr.vmem [resolvable:$true] %s14_s10 }
   0x2   :  { %17 = dma.hbm_to_vmem [thread:$0]  %s13_s8, 256, %s15_s10, [#allocation4]  }
   0x3   :  { %71 = dma.done.wait [#allocation4], 256  }
   0x4   :  { %72 = vsyncadd [#allocation4], 4294967040  ;;  %v27_v0 = vld [vmem:[#allocation3] sm:$0xff]  ;;  %v28_v1 = vld [vmem:[#allocation3 + $0x8] sm:$0xff]  ;;  %vm39_vm0 = vcmask 7168  }
   0x5   :  { %v31_v2 = vmax.f32 %v27_v0, %v28_v1 }
   0x7   :  { %37 = vmax.xlane.f32.xlu0 %v31_v2 }
  0x7a   :  { %v38_v3 = vpop.xlane.xlu0 %37 }
  0x7b   :  { %40 = vst.msk [vmem:[%s91_s1] sm:$0xff] %vm39_vm0, %v38_v3 }
  0x7c   :  { %45 = vsyncpa [#allocation4], 1 }

</bundles_post_ra>
